<compile_context>
chip_gen: v5e
topology: v5e:2x2
jax: 0.10.0
libtpu: 0.0.40
codegen_flags: <defaults>
</compile_context>

<pallas_src>
import functools

import jax
import jax.numpy as jnp
from jax import lax
from jax.experimental import pallas as pl
from jax.experimental.pallas import tpu as pltpu


@functools.lru_cache(maxsize=None)
def _vmem_limit():
    """Generation-aware scoped-VMEM cap (~40 MiB on v7x, ~80 MiB on v5e/v6e)."""
    cap = 128 * 1024 * 1024
    try:
        cap = int(getattr(pltpu.get_tpu_info(), "vmem_capacity_bytes", cap))
    except Exception:
        pass
    return min((cap * 5) // 8, 100 * 1024 * 1024)


def _pick_tile(dim, candidates):
    """Largest candidate that evenly divides `dim`; else the full dim (always legal)."""
    for c in candidates:
        if dim >= c and dim % c == 0:
            return c
    return dim


# ----------------------------- Linear (tiled) ------------------------------


def _linear_kernel(x_ref, w_ref, b_ref, o_ref, acc_ref):
    # x: (tm, tk) f32, w: (tn, tk) f32 [PyTorch (out, in) layout], b: (1, tn) f32.
    @pl.when(pl.program_id(2) == 0)
    def _():
        acc_ref[...] = jnp.zeros_like(acc_ref)

    # bf16 MXU operands, f32 accumulation; contract the last dims of x and w
    # so no in-kernel transpose is needed.
    acc_ref[...] += lax.dot_general(
        x_ref[...].astype(jnp.bfloat16),
        w_ref[...].astype(jnp.bfloat16),
        dimension_numbers=(((1,), (1,)), ((), ())),
        preferred_element_type=jnp.float32,
    )

    @pl.when(pl.program_id(2) == pl.num_programs(2) - 1)
    def _():
        o_ref[...] = (acc_ref[...] + b_ref[...]).astype(o_ref.dtype)


def _linear_tiles(M, Din, Dout, budget_bytes):
    # Prefer tn = full Dout: activations stream exactly once and output stores
    # are lane-dense.  Fall back to large divisors for very wide layers.
    tn = Dout if Dout <= 2048 else _pick_tile(Dout, (2048, 1024, 512, 256, 128))

    def fits(tm, tk):
        # f32 bytes: double-buffered x/w/bias/out tiles + the f32 accumulator.
        return 4 * (2 * (tm * tk + tn * tk + tn + tm * tn) + tm * tn) <= budget_bytes

    tm = None
    for c in (1024, 512, 256, 128):
        if M >= c and M % c == 0 and fits(c, 128):
            tm = c
            break
    if tm is None:
        tm = M  # full dim is always a legal block shape
    tk = None
    for c in (2048, 1024, 512, 256, 128):
        if Din >= c and Din % c == 0 and fits(tm, c):
            tk = c
            break
    if tk is None:
        tk = Din
    return tm, tn, tk


def _tiled_linear(x, w, b, out_dtype=jnp.float32):
    """y = x @ w.T + b.   x: (M, Din), w: (Dout, Din) [PyTorch layout], b: (Dout,)."""
    M, Din = x.shape
    Dout = w.shape[0]
    tm, tn, tk = _linear_tiles(M, Din, Dout, (_vmem_limit() * 9) // 10)
    grid = (M // tm, Dout // tn, Din // tk)

    return pl.pallas_call(
        _linear_kernel,
        out_shape=jax.ShapeDtypeStruct((M, Dout), out_dtype),
        grid=grid,
        in_specs=[
            pl.BlockSpec((tm, tk), lambda i, j, k: (i, k)),
            pl.BlockSpec((tn, tk), lambda i, j, k: (j, k)),
            pl.BlockSpec((1, tn), lambda i, j, k: (0, j)),
        ],
        out_specs=pl.BlockSpec((tm, tn), lambda i, j, k: (i, j)),
        scratch_shapes=[pltpu.VMEM((tm, tn), jnp.float32)],
        compiler_params=pltpu.CompilerParams(
            dimension_semantics=("parallel", "parallel", "arbitrary"),
            vmem_limit_bytes=_vmem_limit(),
        ),
    )(x, w, b.reshape(1, Dout))


# ----------------------------- Attention kernel ----------------------------


def _attn_kernel(q_ref, k_ref, v_ref, attn_ref, dist_ref):
    # Per (batch, head, q-tile) block: q (tq, Dh), k/v (Sk, Dh), all bf16.
    # The module's 2/dim_head scale is already folded into Wq/bq.
    scores = lax.dot_general(
        q_ref[...],
        k_ref[...],
        dimension_numbers=(((1,), (1,)), ((), ())),  # contract Dh, no K transpose
        preferred_element_type=jnp.float32,
    )
    m = jnp.max(scores, axis=-1, keepdims=True)
    e = jnp.exp(scores - m)
    denom = jnp.sum(e, axis=-1, keepdims=True)
    # EUP approximate reciprocal + multiply instead of a full-tile divide.
    dist = e * pl.reciprocal(denom, approx=True)

    dist_ref[...] = dist
    attn_ref[...] = lax.dot_general(
        dist.astype(jnp.bfloat16),
        v_ref[...],
        dimension_numbers=(((1,), (0,)), ((), ())),
        preferred_element_type=jnp.float32,
    )


def _attention(qh, kh, vh):
    B, H, Sq, Dh = qh.shape
    Sk = kh.shape[2]
    tq = _pick_tile(Sq, (512, 256, 128))

    # K/V index maps ignore qi (innermost axis) -> fetched once per (b, h) and
    # resident across all q tiles of that head.
    return pl.pallas_call(
        _attn_kernel,
        out_shape=(
            jax.ShapeDtypeStruct((B, H, Sq, Dh), jnp.float32),
            jax.ShapeDtypeStruct((B, H, Sq, Sk), jnp.float32),
        ),
        grid=(B, H, Sq // tq),
        in_specs=[
            pl.BlockSpec((None, None, tq, Dh), lambda b, h, qi: (b, h, qi, 0)),
            pl.BlockSpec((None, None, Sk, Dh), lambda b, h, qi: (b, h, 0, 0)),
            pl.BlockSpec((None, None, Sk, Dh), lambda b, h, qi: (b, h, 0, 0)),
        ],
        out_specs=(
            pl.BlockSpec((None, None, tq, Dh), lambda b, h, qi: (b, h, qi, 0)),
            pl.BlockSpec((None, None, tq, Sk), lambda b, h, qi: (b, h, qi, 0)),
        ),
        compiler_params=pltpu.CompilerParams(
            dimension_semantics=("parallel", "parallel", "parallel"),
            vmem_limit_bytes=_vmem_limit(),
        ),
    )(qh, kh, vh)


# --------------------------- Module forward pass ---------------------------


def dp_attention_forward(params, Q, K, V, num_head):
    B, Sq, D = Q.shape
    Sk = K.shape[1]
    Sv = V.shape[1]
    dim_head = D // num_head

    # PyTorch quirk reproduced on purpose: `attn_score / (dim_head ** 1 / 2)`
    # == `attn_score / (dim_head / 2)`.  Fold the 2/dim_head scale into Wq/bq
    # once (weight-side, (D,D)) so no per-tile multiply is needed in kernels.
    scale = 2.0 / dim_head
    wq = params["wq"] * scale
    bq = params["bq"] * scale

    if Q is K and K is V:
        # Self-attention from a single source tensor: one matmul with
        # concatenated weights (Dout = 3D) -> zero activation copies.
        w_qkv = jnp.concatenate([wq, params["wk"], params["wv"]], axis=0)
        b_qkv = jnp.concatenate([bq, params["bk"], params["bv"]], axis=0)
        qkv = _tiled_linear(Q.reshape(B * Sq, D), w_qkv, b_qkv, out_dtype=jnp.bfloat16)
        q = qkv[:, :D].reshape(B, Sq, D)
        k = qkv[:, D:2 * D].reshape(B, Sk, D)
        v = qkv[:, 2 * D:].reshape(B, Sv, D)
    else:
        # Separate sources: three pallas_calls, no HBM stacking copy.
        q = _tiled_linear(Q.reshape(B * Sq, D), wq, bq,
                          out_dtype=jnp.bfloat16).reshape(B, Sq, D)
        k = _tiled_linear(K.reshape(B * Sk, D), params["wk"], params["bk"],
                          out_dtype=jnp.bfloat16).reshape(B, Sk, D)
        v = _tiled_linear(V.reshape(B * Sv, D), params["wv"], params["bv"],
                          out_dtype=jnp.bfloat16).reshape(B, Sv, D)

    # Raw reshape exactly as the PyTorch module (NOT split-heads + transpose).
    qh = q.reshape(B, num_head, Sq, dim_head)
    kh = k.reshape(B, num_head, Sk, dim_head)
    vh = v.reshape(B, num_head, Sv, dim_head)

    attn, dist = _attention(qh, kh, vh)

    # Raw reshape back, exactly as the module.
    attn2 = attn.reshape(B * Sq, num_head * dim_head)
    out = _tiled_linear(attn2, params["wo"], params["bo"]).reshape(B, Sq, D)
    return out, dist


# ------------------------------- Reference ---------------------------------


def dp_attention_reference(params, Q, K, V, num_head):
    D = Q.shape[-1]
    dh = D // num_head

    def lin(x, w, b):
        return x @ w.T + b

    q = lin(Q, params["wq"], params["bq"])
    k = lin(K, params["wk"], params["bk"])
    v = lin(V, params["wv"], params["bv"])
    B, Sq, _ = q.shape
    Sk = k.shape[1]
    qh = q.reshape(B, num_head, Sq, dh)
    kh = k.reshape(B, num_head, Sk, dh)
    vh = v.reshape(B, num_head, Sk, dh)
    s = jnp.einsum("bhqd,bhkd->bhqk", qh, kh) / (dh / 2.0)   # module's scale quirk
    dist = jax.nn.softmax(s, axis=-1)
    attn = jnp.einsum("bhqk,bhkd->bhqd", dist, vh).reshape(B, Sq, D)
    out = lin(attn, params["wo"], params["bo"])
    return out, dist


# --------------------------------- Main -------------------------------------


def init_params(key, dim_model):
    # Deterministic init mimicking nn.Linear's uniform(-1/sqrt(fan_in), 1/sqrt(fan_in)).
    bound = 1.0 / (dim_model ** 0.5)
    keys = jax.random.split(key, 8)
    names = ["wq", "bq", "wk", "bk", "wv", "bv", "wo", "bo"]
    params = {}
    for i, name in enumerate(names):
        shape = (dim_model, dim_model) if name.startswith("w") else (dim_model,)
        params[name] = jax.random.uniform(
            keys[i], shape, minval=-bound, maxval=bound, dtype=jnp.float32
        )
    return params


if __name__ == "__main__":
    B, S, D, H = 2, 8, 32, 4  # batch, seq, dim_model, num_head

    key = jax.random.PRNGKey(0)
    kp, kq, kk, kv = jax.random.split(key, 4)
    params = init_params(kp, D)

    Q = jax.random.normal(kq, (B, S, D), dtype=jnp.float32)
    K = jax.random.normal(kk, (B, S, D), dtype=jnp.float32)
    V = jax.random.normal(kv, (B, S, D), dtype=jnp.float32)

    out, dist = dp_attention_forward(params, Q, K, V, H)
    out = jax.block_until_ready(out)
    dist = jax.block_until_ready(dist)

    ref_out, ref_dist = dp_attention_reference(params, Q, K, V, H)

    assert out.shape == (B, S, D)
    assert dist.shape == (B, H, S, S)
    # Tolerance accounts for bf16 MXU operands (f32 accumulation) and the EUP
    # approximate reciprocal in the softmax normalization.
    assert jnp.allclose(out, ref_out, atol=2e-2, rtol=2e-2)
    assert jnp.allclose(dist, ref_dist, atol=2e-2, rtol=2e-2)

    print("KERNEL_OK")
</pallas_src>

<mosaic_0001>
module attributes {stable_mosaic.version = 11 : i64} {
  func.func @_linear_kernel(%arg0: i32, %arg1: i32, %arg2: i32, %arg3: memref<16x32xf32, #tpu.memory_space<vmem>>, %arg4: memref<32x32xf32, #tpu.memory_space<vmem>>, %arg5: memref<1x32xf32, #tpu.memory_space<vmem>>, %arg6: memref<16x32xbf16, #tpu.memory_space<vmem>>, %arg7: memref<16x32xf32, #tpu.memory_space<vmem>>) attributes {dimension_semantics = [#tpu.dimension_semantics<parallel>, #tpu.dimension_semantics<parallel>, #tpu.dimension_semantics<arbitrary>], iteration_bounds = array<i64: 1, 1, 1>, scalar_prefetch = 0 : i64, scratch_operands = 1 : i64, tpu.core_type = #tpu.core_type<tc>, window_params = [{transform_indices = @transform_0, window_bounds = array<i64: 16, 32>}, {transform_indices = @transform_1, window_bounds = array<i64: 32, 32>}, {transform_indices = @transform_2, window_bounds = array<i64: 1, 32>}, {transform_indices = @transform_3, window_bounds = array<i64: 16, 32>}]} {
    %c0_i32 = arith.constant 0 : i32
    %0 = arith.cmpi eq, %arg2, %c0_i32 : i32
    %1 = arith.extui %0 : i1 to i32
    %c0_i32_0 = arith.constant 0 : i32
    %2 = arith.cmpi ne, %1, %c0_i32_0 : i32
    scf.if %2 {
      %cst_10 = arith.constant 0.000000e+00 : f32
      %14 = vector.broadcast %cst_10 : f32 to vector<16x32xf32>
      %c0_11 = arith.constant 0 : index
      %c0_12 = arith.constant 0 : index
      %15 = vector.load %arg7[%c0_11, %c0_12] : memref<16x32xf32, #tpu.memory_space<vmem>>, vector<16x32xf32>
      tpu.vector_store %arg7[%c0_11, %c0_12], %14 {strides = array<i32>} : memref<16x32xf32, #tpu.memory_space<vmem>>, vector<16x32xf32>,
    } else {
    }
    %c0 = arith.constant 0 : index
    %c0_1 = arith.constant 0 : index
    %3 = vector.load %arg7[%c0, %c0_1] : memref<16x32xf32, #tpu.memory_space<vmem>>, vector<16x32xf32>
    %c0_2 = arith.constant 0 : index
    %c0_3 = arith.constant 0 : index
    %4 = vector.load %arg3[%c0_2, %c0_3] : memref<16x32xf32, #tpu.memory_space<vmem>>, vector<16x32xf32>
    %5 = arith.truncf %4 : vector<16x32xf32> to vector<16x32xbf16>
    %c0_4 = arith.constant 0 : index
    %c0_5 = arith.constant 0 : index
    %6 = vector.load %arg4[%c0_4, %c0_5] : memref<32x32xf32, #tpu.memory_space<vmem>>, vector<32x32xf32>
    %7 = arith.truncf %6 : vector<32x32xf32> to vector<32x32xbf16>
    %cst = arith.constant dense<0.000000e+00> : vector<16x32xf32>
    %8 = tpu.matmul %5, %7, %cst {dimension_numbers = #tpu.dot_dimension_numbers<[1], [1], [0], [0], [0, 0, 1, 0], [], []>} : vector<16x32xbf16>, vector<32x32xbf16>, vector<16x32xf32> -> vector<16x32xf32>
    %9 = arith.addf %3, %8 : vector<16x32xf32>
    %c0_6 = arith.constant 0 : index
    %c0_7 = arith.constant 0 : index
    %10 = vector.load %arg7[%c0_6, %c0_7] : memref<16x32xf32, #tpu.memory_space<vmem>>, vector<16x32xf32>
    tpu.vector_store %arg7[%c0_6, %c0_7], %9 {strides = array<i32>} : memref<16x32xf32, #tpu.memory_space<vmem>>, vector<16x32xf32>,
    %c0_i32_8 = arith.constant 0 : i32
    %11 = arith.cmpi eq, %arg2, %c0_i32_8 : i32
    %12 = arith.extui %11 : i1 to i32
    %c0_i32_9 = arith.constant 0 : i32
    %13 = arith.cmpi ne, %12, %c0_i32_9 : i32
    scf.if %13 {
      %c0_10 = arith.constant 0 : index
      %c0_11 = arith.constant 0 : index
      %14 = vector.load %arg7[%c0_10, %c0_11] : memref<16x32xf32, #tpu.memory_space<vmem>>, vector<16x32xf32>
      %c0_12 = arith.constant 0 : index
      %c0_13 = arith.constant 0 : index
      %15 = vector.load %arg5[%c0_12, %c0_13] : memref<1x32xf32, #tpu.memory_space<vmem>>, vector<1x32xf32>
      %16 = vector.broadcast %15 : vector<1x32xf32> to vector<16x32xf32>
      %17 = arith.addf %14, %16 : vector<16x32xf32>
      %18 = arith.truncf %17 : vector<16x32xf32> to vector<16x32xbf16>
      %c0_14 = arith.constant 0 : index
      %c0_15 = arith.constant 0 : index
      %19 = vector.load %arg6[%c0_14, %c0_15] : memref<16x32xbf16, #tpu.memory_space<vmem>>, vector<16x32xbf16>
      tpu.vector_store %arg6[%c0_14, %c0_15], %18 {strides = array<i32>} : memref<16x32xbf16, #tpu.memory_space<vmem>>, vector<16x32xbf16>,
    } else {
    }
    return
  }
  func.func @transform_0(%arg0: i32, %arg1: i32, %arg2: i32) -> (i32, i32) {
    %c0_i32 = arith.constant 0 : i32
    return %arg0, %arg2 : i32, i32
  }
  func.func @transform_1(%arg0: i32, %arg1: i32, %arg2: i32) -> (i32, i32) {
    %c0_i32 = arith.constant 0 : i32
    return %arg1, %arg2 : i32, i32
  }
  func.func @transform_2(%arg0: i32, %arg1: i32, %arg2: i32) -> (i32, i32) {
    %c0_i32 = arith.constant 0 : i32
    %c0_i32_0 = arith.constant 0 : i32
    return %c0_i32, %arg1 : i32, i32
  }
  func.func @transform_3(%arg0: i32, %arg1: i32, %arg2: i32) -> (i32, i32) {
    %c0_i32 = arith.constant 0 : i32
    return %arg0, %arg1 : i32, i32
  }
}

</mosaic_0001>

<bundles_post_ra>
// kernel: tpu_custom_call.1
= control target key start
LH: loop header
LB: loop body
LE: loop exit
PB: predicated region body
PF: predicated region fallthrough
CT: control target
= control target key end

     0   :  { %8 = vsyncpa [#allocation4], 0  ;;  %s265_s0 = inlined_call_operand.hbm [shape: f32[16,32], index: 0, kind: input, shape index: {}]   ;;  %s266_s1 = inlined_call_operand.hbm [shape: f32[32,32], index: 1, kind: input, shape index: {}]   ;;  %s267_s2 = inlined_call_operand.vmem [shape: f32[1,32], index: 2, kind: input, shape index: {}]   ;;  %s268_s3 = inlined_call_operand.hbm [shape: bf16[16,32], index: 3, kind: output, shape index: {}]  }
   0x1   :  { %9 = vsyncpa [#allocation7], 0 }
   0x2   :  { %10 = vsyncpa [#allocation5], 0  ;;  %s15_s14 = sshll.u32 %s265_s0, 4  ;;  %s218_s15 = smov [#allocation3]   ;;  %s16_s14 = int_to_ptr.hbm [resolvable:$true] %s15_s14 }
   0x3   :  { %s17_s16 = sshll.u32 %s218_s15, 4  ;;  %s28_s19 = sshll.u32 %s266_s1, 4  ;;  %s18_s16 = int_to_ptr.vmem [resolvable:$true] %s17_s16  ;;  %s29_s19 = int_to_ptr.hbm [resolvable:$true] %s28_s19 }
   0x4   :  { %s219_s20 = smov 128   ;;  %s220_s21 = smov 8  }
   0x5   :  { %23 = dma.hbm_to_vmem [thread:$0]  %s16_s14, 256, %s18_s16, [#allocation4], %s219_s20, %s219_s20, %s220_s21  }
   0x6   :  { %s221_s22 = smov [#allocation6]  }
   0x7   :  { %s30_s23 = sshll.u32 %s221_s22, 4  ;;  %s31_s23 = int_to_ptr.vmem [resolvable:$true] %s30_s23 }
   0x8   :  { %36 = dma.hbm_to_vmem [thread:$0]  %s29_s19, 512, %s31_s23, [#allocation7], %s219_s20, %s219_s20, %s220_s21  }
   0x9   :  { %212 = dma.done.wait [#allocation4], 256  }
   0xa   :  { %213 = vsyncadd [#allocation4], 4294967040 }
   0xb   :  { %214 = dma.done.wait [#allocation7], 512  }
   0xc   :  { %215 = vsyncadd [#allocation7], 4294966784  ;;  %vm52_vm0 = vcmask 261120   ;;  %v222_v0 = vmov 0.0   ;;  %v62_v1 = vld [vmem:[#allocation6 + $0x10] sm:$0xff]  ;;  %v63_v2 = vld [vmem:[#allocation6 + $0x18] sm:$0xff] }
   0xd   :  { %53 = vst.msk [vmem:[#allocation2] sm:$0xff] %vm52_vm0, %v222_v0  ;;  %v65_v3 = vpack.c.bf16 %v63_v2, %v62_v1  ;;  %v60_v4 = vld [vmem:[#allocation6] sm:$0xff]  ;;  %v61_v5 = vld [vmem:[#allocation6 + $0x8] sm:$0xff]  ;;  %v57_v9 = vld [vmem:[#allocation3] sm:$0xff]  ;;  %vm107_vm1 = vcmask 257024   ;;  %s223_s24 = smov [#allocation8]  }
   0xe   :  { %54 = vst.msk [vmem:[#allocation2 + $0x8] sm:$0xff] %vm52_vm0, %v222_v0  ;;  %v64_v7 = vpack.c.bf16 %v61_v5, %v60_v4  ;;  %v58_v10 = vld [vmem:[#allocation3 + $0x8] sm:$0xff]  ;;  %v139_v16 = vld [vmem:[%s267_s2] ss:$0 sm:$0xff]  ;;  %s114_s25 = sshll.u32 %s223_s24, 4  ;;  %s116_s28 = sshll.u32 %s268_s3, 4  ;;  %s115_s25 = int_to_ptr.vmem [resolvable:$true] %s114_s25  ;;  %s117_s28 = int_to_ptr.hbm [resolvable:$true] %s116_s28 }
   0xf   :  { %v74_v6 = vsel %vm52_vm0, %v65_v3, 0  ;;  %v59_v11 = vpack.c.bf16 %v58_v10, %v57_v9  ;;  %s224_s2 = smov 64   ;;  %s225_s29 = smov 4  }
  0x10   :  { %82 = vmatpush.bf16.xpose.msra.mxu0 %v74_v6  ;;  %v71_v8 = vsel %vm52_vm0, %v64_v7, 0 }
  0x14   :  { %v55_v12 = vld [vmem:[#allocation2] sm:$0xff] }
  0x15   :  { %v56_v15 = vld [vmem:[#allocation2 + $0x8] sm:$0xff] }
  0x18   :  { %83 = vmatpush.bf16.xpose.msra.mxu0 %v71_v8 }
  0x1f   :  { %130 = vmatmul.msk.bf16.vlgmr.msra.gmra.mxu0 %vm52_vm0, %v59_v11 }
  0x9c   :  { %v85_v13 = vpop.f32.mrf.mxu0 }
  0x9d   :  { %v90_v14 = vadd.f32 %v85_v13, %v55_v12 }
  0x9f   :  { %92 = vst.msk [vmem:[#allocation2] sm:$0xff] %vm52_vm0, %v90_v14 }
  0xa4   :  { %v87_v17 = vpop.f32.mrf.mxu0 }
  0xa5   :  { %v91_v18 = vadd.f32 %v87_v17, %v56_v15 }
  0xa6   :  { %v97_v19 = vld [vmem:[#allocation2] sm:$0xff] }
  0xa7   :  { %93 = vst.msk [vmem:[#allocation2 + $0x8] sm:$0xff] %vm52_vm0, %v91_v18  ;;  %v103_v20 = vadd.f32 %v139_v16, %v97_v19 }
  0xa9   :  { %v105_v21 = vpack.c.bf16 %v103_v20, %v103_v20 }
  0xab   :  { %108 = vst.msk [vmem:[#allocation8] sm:$0xf] %vm107_vm1, %v105_v21 }
  0xae   :  { %v98_v22 = vld [vmem:[#allocation2 + $0x8] sm:$0xff] }
  0xaf   :  { %v104_v23 = vadd.f32 %v139_v16, %v98_v22 }
  0xb1   :  { %v106_v24 = vpack.c.bf16 %v104_v23, %v104_v23 }
  0xb3   :  { %109 = vst.msk [vmem:[#allocation8 + $0x4] sm:$0xf] %vm107_vm1, %v106_v24 }
  0xb4   :  { %122 = dma.vmem_to_hbm [thread:$0]  %s115_s25, 128, %s117_s28, [#allocation5], %s224_s2, %s224_s2, %s225_s29  }
  0xb5   :  { %216 = dma.done.wait [#allocation5], 128  }
  0xb6   :  { %217 = vsyncadd [#allocation5], 4294967168 }
  0xb7   :  { %127 = vsyncpa [#allocation4], 1 }
  0xb8   :  { %128 = vsyncpa [#allocation7], 1 }
  0xb9   :  { %129 = vsyncpa [#allocation5], 1 }

</bundles_post_ra>
